<compile_context>
chip_gen: v5e
topology: v5e:2x2
jax: 0.10.0
libtpu: 0.0.40
codegen_flags: <defaults>
</compile_context>

<pallas_src>
import math

import jax
import jax.numpy as jnp
from jax.experimental import pallas as pl
from jax.experimental.pallas import tpu as pltpu


# ------------------------------ kernel body ---------------------------------

def _add_pe_kernel(x_ref, pe_ref, o_ref):
    # x_ref: (TB, TN) in x.dtype; pe_ref: (1, TN) float32 (sublane broadcast).
    # Add promotes to f32, sum is cast to the output dtype on store.
    o_ref[...] = (x_ref[...] + pe_ref[...]).astype(o_ref.dtype)


# ------------------------------ tiling policy -------------------------------

def _per_buffer_budget_bytes() -> int:
    """Per-VMEM-buffer tile budget keyed on TPU generation (scoped-VMEM safe)."""
    try:
        kind = jax.devices()[0].device_kind.lower()
    except Exception:
        kind = ""
    if "v5" in kind:
        # v5e: ~820 GB/s HBM, 16 MiB scoped-VMEM default -> 2-3 MiB is enough
        # to amortize step overhead and 2x(in)+2x(out) stays ~12 MiB.
        return 3 * 1024 * 1024
    if "v6" in kind or "v7" in kind:
        # v6e (128 MiB phys / 32 MiB scoped default) and v7x (64 MiB phys /
        # 32 MiB default): 6 MiB/buffer -> ~24 MiB double-buffered footprint.
        return 6 * 1024 * 1024
    return 4 * 1024 * 1024  # unknown chip: conservative middle ground


def _choose_tiles(B: int, N: int, itemsize: int, max_bytes_per_buf: int):
    """Pick (TB, TN): lane-dense, (8,128)-legal, sized to the per-chip budget."""
    # Batch-row tile: full B (always legal) when small, else a multiple of 8.
    tb = B if B <= 256 else 256
    # Column tile over the flattened S*D axis: multiple of 128 (or full dim),
    # never below 512 elements (>= 2 KiB/row for f32) to keep DMAs efficient.
    max_elems = max(512, max_bytes_per_buf // (itemsize * tb))
    if N <= max_elems:
        tn = N                                        # full dim -> legal as-is
    else:
        tn = min(N, max(512, (max_elems // 128) * 128))
    return tb, tn


# ------------------------------ forward pass --------------------------------

def positional_encoding_forward(x: jnp.ndarray, pe_row: jnp.ndarray, *,
                                min_pallas_bytes: int = 1 << 20) -> jnp.ndarray:
    """x: (B, S, D); pe_row: (1, S*D) float32, pre-sliced & pre-flattened.

    Returns (x + pe).astype(x.dtype).  Dropout is eval-mode (identity).
    """
    B, S, D = x.shape
    N = S * D
    assert pe_row.shape == (1, N), "pe_row must be the (1, S*D) flattened table"

    itemsize = jnp.dtype(x.dtype).itemsize
    x2 = x.reshape(B, N)                      # layout-preserving (free)

    # Small-input fast path: pallas_call launch + grid machinery dominates tiny
    # tensors; a plain fused XLA add is strictly faster there.
    if B * N * itemsize < min_pallas_bytes:
        return (x2 + pe_row).astype(x.dtype).reshape(B, S, D)

    tb, tn = _choose_tiles(B, N, itemsize, _per_buffer_budget_bytes())

    # Columns outer, batch inner: pe's block index is constant along the inner
    # axis so it stays resident instead of being re-DMA'd once per batch block.
    grid = (pl.cdiv(N, tn), pl.cdiv(B, tb))

    cost = pl.CostEstimate(
        flops=B * N,
        transcendentals=0,
        bytes_accessed=2 * B * N * itemsize + N * 4,   # x read + out write + pe read
    )

    out2 = pl.pallas_call(
        _add_pe_kernel,
        out_shape=jax.ShapeDtypeStruct((B, N), x.dtype),
        grid_spec=pltpu.PrefetchScalarGridSpec(
            num_scalar_prefetch=0,
            grid=grid,
            in_specs=[
                pl.BlockSpec((tb, tn), lambda j, i: (i, j)),   # x tile
                pl.BlockSpec((1, tn), lambda j, i: (0, j)),    # pe tile (batch-shared)
            ],
            out_specs=pl.BlockSpec((tb, tn), lambda j, i: (i, j)),
        ),
        compiler_params=pltpu.CompilerParams(
            dimension_semantics=("parallel", "parallel"),
        ),
        cost_estimate=cost,
        input_output_aliases={0: 0},   # reuse x's HBM buffer when x is donated
    )(x2, pe_row)

    return out2.reshape(B, S, D)


# ------------------------------ module wrapper -------------------------------

def make_positional_encoding(d_model: int, seq_len: int) -> jnp.ndarray:
    """(seq_len, d_model) sinusoidal table, exactly like the PyTorch module."""
    position = jnp.arange(0, seq_len, dtype=jnp.float32)[:, None]             # (S, 1)
    div_term = jnp.exp(
        jnp.arange(0, d_model, 2, dtype=jnp.float32) * (-math.log(10000.0) / d_model)
    )                                                                          # (D/2,)
    angles = position * div_term                                               # (S, D/2)
    pe = jnp.zeros((seq_len, d_model), dtype=jnp.float32)
    pe = pe.at[:, 0::2].set(jnp.sin(angles))
    pe = pe.at[:, 1::2].set(jnp.cos(angles))
    return pe


class PositionalEncoding:
    """Eval-mode Pallas equivalent of the PyTorch PositionalEncoding module."""

    def __init__(self, d_model: int, seq_len: int, dropout: float = 0.0):
        self.d_model = d_model
        self.seq_len = seq_len
        self.dropout = dropout
        # TODO(synk): training-mode dropout (Bernoulli mask + 1/(1-p) scaling)
        #             would use pltpu.prng_seed / pltpu.stateful_bernoulli;
        #             eval-mode (identity) semantics are implemented here.
        self.pe = make_positional_encoding(d_model, seq_len)   # (seq_len, d_model) f32
        self._pe_row_cache = {}   # S -> (1, S*d_model) float32 (hoisted prep)

    def _pe_row(self, S: int) -> jnp.ndarray:
        if S not in self._pe_row_cache:
            row = self.pe[:S, :].reshape(1, S * self.d_model)
            self._pe_row_cache[S] = jax.block_until_ready(row)
        return self._pe_row_cache[S]

    def __call__(self, x: jnp.ndarray, *, min_pallas_bytes: int = 1 << 20):
        B, S, D = x.shape
        assert D == self.d_model and S <= self.seq_len
        return positional_encoding_forward(
            x, self._pe_row(S), min_pallas_bytes=min_pallas_bytes)


# ---------------------------------- test -------------------------------------

if __name__ == "__main__":
    # Small shapes consistent with the module: batch=2, seq=8, d_model=32.
    B, S, D = 2, 8, 32
    seq_len = 16   # buffer seq_len >= actual sequence length (module slices it)

    key = jax.random.PRNGKey(0)
    x = jax.random.normal(key, (B, S, D), dtype=jnp.float32)

    module = PositionalEncoding(d_model=D, seq_len=seq_len, dropout=0.0)

    # Force the Pallas path even at this tiny smoke-test shape.
    out = module(x, min_pallas_bytes=0)
    out = jax.block_until_ready(out)

    # Reference check in plain JAX (eval-mode dropout == identity).
    ref = x + module.pe[:S, :][None, :, :]
    assert out.shape == (B, S, D)
    assert jnp.allclose(out, ref, atol=1e-6), "Pallas output mismatch vs reference"

    print("KERNEL_OK")
</pallas_src>

<mosaic_0001>
module attributes {stable_mosaic.version = 11 : i64} {
  func.func @_add_pe_kernel(%arg0: i32, %arg1: i32, %arg2: memref<2x256xf32, #tpu.memory_space<vmem>>, %arg3: memref<1x256xf32, #tpu.memory_space<vmem>>, %arg4: memref<2x256xf32, #tpu.memory_space<vmem>>) attributes {dimension_semantics = [#tpu.dimension_semantics<parallel>, #tpu.dimension_semantics<parallel>], iteration_bounds = array<i64: 1, 1>, scalar_prefetch = 0 : i64, scratch_operands = 0 : i64, tpu.core_type = #tpu.core_type<tc>, window_params = [{transform_indices = @transform_0, window_bounds = array<i64: 2, 256>}, {transform_indices = @transform_1, window_bounds = array<i64: 1, 256>}, {transform_indices = @transform_2, window_bounds = array<i64: 2, 256>}]} {
    %c0 = arith.constant 0 : index
    %c0_0 = arith.constant 0 : index
    %0 = vector.load %arg2[%c0, %c0_0] : memref<2x256xf32, #tpu.memory_space<vmem>>, vector<2x256xf32>
    %c0_1 = arith.constant 0 : index
    %c0_2 = arith.constant 0 : index
    %1 = vector.load %arg3[%c0_1, %c0_2] : memref<1x256xf32, #tpu.memory_space<vmem>>, vector<1x256xf32>
    %2 = vector.broadcast %1 : vector<1x256xf32> to vector<2x256xf32>
    %3 = arith.addf %0, %2 : vector<2x256xf32>
    %c0_3 = arith.constant 0 : index
    %c0_4 = arith.constant 0 : index
    %4 = vector.load %arg4[%c0_3, %c0_4] : memref<2x256xf32, #tpu.memory_space<vmem>>, vector<2x256xf32>
    tpu.vector_store %arg4[%c0_3, %c0_4], %3 {strides = array<i32>} : memref<2x256xf32, #tpu.memory_space<vmem>>, vector<2x256xf32>,
    return
  }
  func.func @transform_0(%arg0: i32, %arg1: i32) -> (i32, i32) {
    %c0_i32 = arith.constant 0 : i32
    return %arg1, %arg0 : i32, i32
  }
  func.func @transform_1(%arg0: i32, %arg1: i32) -> (i32, i32) {
    %c0_i32 = arith.constant 0 : i32
    %c0_i32_0 = arith.constant 0 : i32
    return %c0_i32, %arg0 : i32, i32
  }
  func.func @transform_2(%arg0: i32, %arg1: i32) -> (i32, i32) {
    %c0_i32 = arith.constant 0 : i32
    return %arg1, %arg0 : i32, i32
  }
}

</mosaic_0001>

<bundles_post_ra>
// kernel: tpu_custom_call.1
= control target key start
LH: loop header
LB: loop body
LE: loop exit
PB: predicated region body
PF: predicated region fallthrough
CT: control target
= control target key end

     0   :  { %7 = vsyncpa [#allocation3], 0  ;;  %s134_s0 = inlined_call_operand.hbm [shape: f32[2,256], index: 0, kind: input, shape index: {}, may-alias: {0,2}]   ;;  %s135_s1 = inlined_call_operand.vmem [shape: f32[1,256], index: 1, kind: input, shape index: {}]   ;;  %s136_s2 = inlined_call_operand.hbm [shape: f32[2,256], index: 2, kind: output, shape index: {}, may-alias: {0,2}]  }
   0x1   :  { %8 = vsyncpa [#allocation4], 0  ;;  %s14_s11 = sshll.u32 %s134_s0, 4  ;;  %s108_s12 = smov [#allocation2]   ;;  %s15_s11 = int_to_ptr.hbm [resolvable:$true] %s14_s11 }
   0x2   :  { %s16_s13 = sshll.u32 %s108_s12, 4  ;;  %s17_s13 = int_to_ptr.vmem [resolvable:$true] %s16_s13 }
   0x3   :  { %19 = dma.hbm_to_vmem [thread:$0]  %s15_s11, 64, %s17_s13, [#allocation3]  }
   0x4   :  { %104 = dma.done.wait [#allocation3], 64  }
   0x5   :  { %105 = vsyncadd [#allocation3], 4294967232  ;;  %v27_v0 = vld [vmem:[%s135_s1] sm:$0x3]  ;;  %vm32_vm0 = vcmask 1041408   ;;  %s109_s16 = smov [#allocation5]  }
   0x6   :  { %v29_v1 = vperm.slane %v27_v0, 0  ;;  %v30_v2 = vperm.slane %v27_v0, 1  ;;  %v26_v3 = vld [vmem:[#allocation2] sm:$0xf]  ;;  %s42_s17 = sshll.u32 %s109_s16, 4  ;;  %s44_s19 = sshll.u32 %s136_s2, 4  ;;  %s43_s17 = int_to_ptr.vmem [resolvable:$true] %s42_s17  ;;  %s45_s19 = int_to_ptr.hbm [resolvable:$true] %s44_s19 }
   0x8   :  { %v31_v4 = vrot.slane %v30_v2, 6 }
   0xa   :  { %v33_v5 = vsel %vm32_vm0, %v29_v1, %v31_v4 }
   0xb   :  { %v35_v6 = vadd.f32 %v33_v5, %v26_v3 }
   0xd   :  { %36 = vst [vmem:[#allocation5] sm:$0xf] %v35_v6 }
   0xe   :  { %47 = dma.vmem_to_hbm [thread:$0]  %s43_s17, 64, %s45_s19, [#allocation4]  }
   0xf   :  { %106 = dma.done.wait [#allocation4], 64  }
  0x10   :  { %107 = vsyncadd [#allocation4], 4294967232 }
  0x11   :  { %52 = vsyncpa [#allocation3], 1 }
  0x12   :  { %53 = vsyncpa [#allocation4], 1 }

</bundles_post_ra>
